<compile_context>
chip_gen: v6e
topology: v6e:2x2x1
jax: 0.10.0
libtpu: 0.0.40
codegen_flags: <defaults>
</compile_context>

<pallas_src>
import functools

import jax
import jax.numpy as jnp
from jax import lax
from jax.experimental import pallas as pl
from jax.experimental.pallas import tpu as pltpu

_LANES = 128
_ACC_ROWS = 8                      # one (8,128) vreg accumulator
_ALIGN = _ACC_ROWS * _LANES        # kernel consumes a 1024-element-aligned prefix


def _chip_config():
    """(num_core_splits, target_tile_bytes_per_input, vmem_limit_bytes)."""
    kind = ""
    try:
        kind = jax.devices()[0].device_kind.lower()
    except Exception:  # non-TPU / unknown backend: use conservative defaults
        pass
    if "v7" in kind or "7x" in kind:
        # v7x: 2 TCs/chip, ~1.6 TB/s/TC, but only 64 MiB VMEM per TC.
        # 8 MiB/input/step => 2 inputs x 2 buffers x 8 MiB = 32 MiB + tiny acc.
        return 2, 8 * 1024 * 1024, 44 * 1024 * 1024
    # v5e / v6e: single TensorCore; ~4 MiB/input/step is past the bandwidth
    # knee (~85% of roofline) and fits comfortably under 32 MiB scoped VMEM.
    return 1, 4 * 1024 * 1024, 32 * 1024 * 1024


def _loss_partial_kernel(p_ref, g_ref, o_ref, acc_ref, *, rows, block_rows,
                         per_core):
    core = pl.program_id(0)
    step = pl.program_id(1)

    @pl.when(step == 0)
    def _():
        acc_ref[...] = jnp.zeros_like(acc_ref)

    blk = core * per_core + step          # logical block id (may overhang)
    start_row = blk * block_rows

    d = g_ref[...].astype(jnp.float32) - p_ref[...].astype(jnp.float32)
    contrib = jnp.abs(d) + d * d

    # Only a partial last block (or a clamped overhang iteration on the second
    # core) needs masking; full blocks take the cheap path.
    is_edge = (start_row + block_rows) > rows

    @pl.when(jnp.logical_not(is_edge))
    def _():
        acc_ref[...] += jnp.sum(
            contrib.reshape(-1, _ACC_ROWS, _LANES), axis=0)

    @pl.when(is_edge)
    def _():
        row_ids = lax.broadcasted_iota(jnp.int32, contrib.shape, 0)
        valid = (row_ids + start_row) < rows
        # where() selects, so garbage (even NaN) in the unread tail is dropped.
        masked = jnp.where(valid, contrib, 0.0)
        acc_ref[...] += jnp.sum(
            masked.reshape(-1, _ACC_ROWS, _LANES), axis=0)

    @pl.when(step == per_core - 1)
    def _():
        # Single full-block, lane-dense store of the per-lane partial sums.
        o_ref[...] = acc_ref[...]


def l1_and_l2_loss(g_pred, g_gt, *, block_rows=None):
    """Pallas equivalent of L1andL2Loss.forward for (N, C, ...) inputs."""
    assert g_pred.shape == g_gt.shape
    assert g_pred.ndim >= 2, "expects (N, C, ...) inputs"
    channels = g_pred.shape[1]
    total = g_pred.size
    # mean is taken over everything except the channel dim
    divisor = jnp.float32(total // channels)

    p_flat = g_pred.reshape(-1)
    g_flat = g_gt.reshape(-1)

    num_cores, tile_bytes, vmem_limit = _chip_config()
    itemsize = jnp.dtype(g_pred.dtype).itemsize
    if block_rows is None:
        block_rows = (tile_bytes // (_LANES * itemsize)) // _ACC_ROWS * _ACC_ROWS
        block_rows = max(_ACC_ROWS, block_rows)
    else:
        assert block_rows % _ACC_ROWS == 0, "block_rows must be a multiple of 8"

    # Kernel consumes the 1024-aligned prefix; the <=1023-element tail is
    # folded in with plain JAX (no whole-array pad / concatenate copy).
    main = (total // _ALIGN) * _ALIGN
    if main < total:
        dt = g_flat[main:].astype(jnp.float32) - p_flat[main:].astype(jnp.float32)
        tail = jnp.sum(jnp.abs(dt) + dt * dt)
    else:
        tail = jnp.float32(0.0)

    if main == 0:
        # Tiny input: everything fit in the tail path.
        return tail / divisor

    rows = main // _LANES             # multiple of 8
    # Aligned case: zero-copy bitcast reshape of the full flat array.
    p2d = (p_flat if main == total else p_flat[:main]).reshape(rows, _LANES)
    g2d = (g_flat if main == total else g_flat[:main]).reshape(rows, _LANES)

    if rows <= block_rows:
        block_rows = rows             # single full-extent block is always legal

    num_blocks = (rows + block_rows - 1) // block_rows
    if num_blocks < 2:
        num_cores = 1                 # no point splitting a single block
    per_core = (num_blocks + num_cores - 1) // num_cores
    grid = (num_cores, per_core)

    if num_cores == 1:
        def in_index_map(core, step):
            return (step, 0)
    else:
        def in_index_map(core, step):
            # Clamp so the overhang iteration on the second core stays in
            # bounds; its contribution is masked out inside the kernel.
            return (jnp.minimum(core * per_core + step, num_blocks - 1), 0)

    kernel = functools.partial(_loss_partial_kernel, rows=rows,
                               block_rows=block_rows, per_core=per_core)

    cost = pl.CostEstimate(
        flops=5 * total,
        transcendentals=0,
        bytes_accessed=2 * main * itemsize + num_cores * _ACC_ROWS * _LANES * 4,
    )

    partials = pl.pallas_call(
        kernel,
        out_shape=jax.ShapeDtypeStruct((num_cores * _ACC_ROWS, _LANES),
                                       jnp.float32),
        grid_spec=pltpu.PrefetchScalarGridSpec(
            num_scalar_prefetch=0,
            grid=grid,
            in_specs=[
                pl.BlockSpec((block_rows, _LANES), in_index_map),
                pl.BlockSpec((block_rows, _LANES), in_index_map),
            ],
            out_specs=pl.BlockSpec((_ACC_ROWS, _LANES),
                                   lambda core, step: (core, 0)),
            scratch_shapes=[pltpu.VMEM((_ACC_ROWS, _LANES), jnp.float32)],
        ),
        compiler_params=pltpu.CompilerParams(
            dimension_semantics=("parallel", "arbitrary"),
            vmem_limit_bytes=vmem_limit,
        ),
        cost_estimate=cost,
    )(p2d, g2d)

    # Each core wrote one (8,128) slab of per-lane partial sums.
    return (jnp.sum(partials) + tail) / divisor


def _reference(g_pred, g_gt):
    d = g_gt.astype(jnp.float32) - g_pred.astype(jnp.float32)
    l1 = jnp.mean(jnp.sum(jnp.abs(d), axis=1))
    l2 = jnp.mean(jnp.sum(d * d, axis=1))
    return l1 + l2


if __name__ == "__main__":
    key = jax.random.PRNGKey(0)
    k1, k2 = jax.random.split(key)
    # NCHW, small shapes: batch=2, channels=4, spatial=16x16
    g_pred = jax.random.normal(k1, (2, 4, 16, 16), dtype=jnp.float32)
    g_gt = jax.random.normal(k2, (2, 4, 16, 16), dtype=jnp.float32)

    out = jax.jit(l1_and_l2_loss)(g_pred, g_gt)
    out = jax.block_until_ready(out)

    ref = _reference(g_pred, g_gt)
    assert jnp.allclose(out, ref, rtol=1e-5, atol=1e-5), (out, ref)
    print("KERNEL_OK")
</pallas_src>

<mosaic_0001>
module attributes {stable_mosaic.version = 11 : i64} {
  func.func @_loss_partial_kernel(%arg0: i32, %arg1: i32, %arg2: memref<16x128xf32, #tpu.memory_space<vmem>>, %arg3: memref<16x128xf32, #tpu.memory_space<vmem>>, %arg4: memref<8x128xf32, #tpu.memory_space<vmem>>, %arg5: memref<8x128xf32, #tpu.memory_space<vmem>>) attributes {dimension_semantics = [#tpu.dimension_semantics<parallel>, #tpu.dimension_semantics<arbitrary>], iteration_bounds = array<i64: 1, 1>, scalar_prefetch = 0 : i64, scratch_operands = 1 : i64, tpu.core_type = #tpu.core_type<tc>, window_params = [{transform_indices = @transform_0, window_bounds = array<i64: 16, 128>}, {transform_indices = @transform_1, window_bounds = array<i64: 16, 128>}, {transform_indices = @transform_2, window_bounds = array<i64: 8, 128>}]} {
    %c0_i32 = arith.constant 0 : i32
    %0 = arith.cmpi eq, %arg1, %c0_i32 : i32
    %1 = arith.extui %0 : i1 to i32
    %c0_i32_0 = arith.constant 0 : i32
    %2 = arith.cmpi ne, %1, %c0_i32_0 : i32
    scf.if %2 {
      %cst = arith.constant 0.000000e+00 : f32
      %22 = vector.broadcast %cst : f32 to vector<8x128xf32>
      %c0_10 = arith.constant 0 : index
      %c0_11 = arith.constant 0 : index
      %23 = vector.load %arg5[%c0_10, %c0_11] : memref<8x128xf32, #tpu.memory_space<vmem>>, vector<8x128xf32>
      tpu.vector_store %arg5[%c0_10, %c0_11], %22 {strides = array<i32>} : memref<8x128xf32, #tpu.memory_space<vmem>>, vector<8x128xf32>,
    } else {
    }
    %c1_i32 = arith.constant 1 : i32
    %3 = arith.muli %arg0, %c1_i32 : i32
    %4 = arith.addi %3, %arg1 : i32
    %c16_i32 = arith.constant 16 : i32
    %5 = arith.muli %4, %c16_i32 : i32
    %c0 = arith.constant 0 : index
    %c0_1 = arith.constant 0 : index
    %6 = vector.load %arg3[%c0, %c0_1] : memref<16x128xf32, #tpu.memory_space<vmem>>, vector<16x128xf32>
    %c0_2 = arith.constant 0 : index
    %c0_3 = arith.constant 0 : index
    %7 = vector.load %arg2[%c0_2, %c0_3] : memref<16x128xf32, #tpu.memory_space<vmem>>, vector<16x128xf32>
    %8 = arith.subf %6, %7 : vector<16x128xf32>
    %9 = math.absf %8 : vector<16x128xf32>
    %10 = arith.mulf %8, %8 : vector<16x128xf32>
    %11 = arith.addf %9, %10 : vector<16x128xf32>
    %c16_i32_4 = arith.constant 16 : i32
    %12 = arith.addi %5, %c16_i32_4 : i32
    %c16_i32_5 = arith.constant 16 : i32
    %13 = arith.cmpi sgt, %12, %c16_i32_5 : i32
    %true = arith.constant true
    %14 = arith.xori %13, %true : i1
    %15 = arith.extui %14 : i1 to i32
    %c0_i32_6 = arith.constant 0 : i32
    %16 = arith.cmpi ne, %15, %c0_i32_6 : i32
    scf.if %16 {
      %c0_10 = arith.constant 0 : index
      %c0_11 = arith.constant 0 : index
      %22 = vector.load %arg5[%c0_10, %c0_11] : memref<8x128xf32, #tpu.memory_space<vmem>>, vector<8x128xf32>
      %23 = vector.shape_cast %11 : vector<16x128xf32> to vector<2x8x128xf32>
      %cst = arith.constant dense<0.000000e+00> : vector<8x128xf32>
      %24 = vector.multi_reduction <add>, %23, %cst [0] : vector<2x8x128xf32> to vector<8x128xf32>
      %25 = arith.addf %22, %24 : vector<8x128xf32>
      %c0_12 = arith.constant 0 : index
      %c0_13 = arith.constant 0 : index
      %26 = vector.load %arg5[%c0_12, %c0_13] : memref<8x128xf32, #tpu.memory_space<vmem>>, vector<8x128xf32>
      tpu.vector_store %arg5[%c0_12, %c0_13], %25 {strides = array<i32>} : memref<8x128xf32, #tpu.memory_space<vmem>>, vector<8x128xf32>,
    } else {
    }
    %17 = arith.extui %13 : i1 to i32
    %c0_i32_7 = arith.constant 0 : i32
    %18 = arith.cmpi ne, %17, %c0_i32_7 : i32
    scf.if %18 {
      %22 = tpu.iota {dimensions = array<i32: 0>} : vector<16x128xi32>
      %23 = vector.broadcast %5 : i32 to vector<16x128xi32>
      %24 = arith.addi %22, %23 : vector<16x128xi32>
      %c16_i32_10 = arith.constant 16 : i32
      %25 = vector.broadcast %c16_i32_10 : i32 to vector<16x128xi32>
      %26 = arith.cmpi slt, %24, %25 : vector<16x128xi32>
      %cst = arith.constant 0.000000e+00 : f32
      %27 = vector.broadcast %cst : f32 to vector<16x128xf32>
      %28 = arith.select %26, %11, %27 : vector<16x128xi1>, vector<16x128xf32>
      %c0_11 = arith.constant 0 : index
      %c0_12 = arith.constant 0 : index
      %29 = vector.load %arg5[%c0_11, %c0_12] : memref<8x128xf32, #tpu.memory_space<vmem>>, vector<8x128xf32>
      %30 = vector.shape_cast %28 : vector<16x128xf32> to vector<2x8x128xf32>
      %cst_13 = arith.constant dense<0.000000e+00> : vector<8x128xf32>
      %31 = vector.multi_reduction <add>, %30, %cst_13 [0] : vector<2x8x128xf32> to vector<8x128xf32>
      %32 = arith.addf %29, %31 : vector<8x128xf32>
      %c0_14 = arith.constant 0 : index
      %c0_15 = arith.constant 0 : index
      %33 = vector.load %arg5[%c0_14, %c0_15] : memref<8x128xf32, #tpu.memory_space<vmem>>, vector<8x128xf32>
      tpu.vector_store %arg5[%c0_14, %c0_15], %32 {strides = array<i32>} : memref<8x128xf32, #tpu.memory_space<vmem>>, vector<8x128xf32>,
    } else {
    }
    %c0_i32_8 = arith.constant 0 : i32
    %19 = arith.cmpi eq, %arg1, %c0_i32_8 : i32
    %20 = arith.extui %19 : i1 to i32
    %c0_i32_9 = arith.constant 0 : i32
    %21 = arith.cmpi ne, %20, %c0_i32_9 : i32
    scf.if %21 {
      %c0_10 = arith.constant 0 : index
      %c0_11 = arith.constant 0 : index
      %22 = vector.load %arg5[%c0_10, %c0_11] : memref<8x128xf32, #tpu.memory_space<vmem>>, vector<8x128xf32>
      %c0_12 = arith.constant 0 : index
      %c0_13 = arith.constant 0 : index
      %23 = vector.load %arg4[%c0_12, %c0_13] : memref<8x128xf32, #tpu.memory_space<vmem>>, vector<8x128xf32>
      tpu.vector_store %arg4[%c0_12, %c0_13], %22 {strides = array<i32>} : memref<8x128xf32, #tpu.memory_space<vmem>>, vector<8x128xf32>,
    } else {
    }
    return
  }
  func.func @transform_0(%arg0: i32, %arg1: i32) -> (i32, i32) {
    %c0_i32 = arith.constant 0 : i32
    %c0_i32_0 = arith.constant 0 : i32
    return %arg1, %c0_i32 : i32, i32
  }
  func.func @transform_1(%arg0: i32, %arg1: i32) -> (i32, i32) {
    %c0_i32 = arith.constant 0 : i32
    %c0_i32_0 = arith.constant 0 : i32
    return %arg1, %c0_i32 : i32, i32
  }
  func.func @transform_2(%arg0: i32, %arg1: i32) -> (i32, i32) {
    %c0_i32 = arith.constant 0 : i32
    %c0_i32_0 = arith.constant 0 : i32
    return %arg0, %c0_i32 : i32, i32
  }
}

</mosaic_0001>

<bundles_post_ra>
// kernel: l1_and_l2_loss.1
= control target key start
LH: loop header
LB: loop body
LE: loop exit
PB: predicated region body
PF: predicated region fallthrough
CT: control target
= control target key end

     0   :  { %s96_s0 = inlined_call_operand.vmem [shape: f32[16,128], index: 0, kind: input, shape index: {}]   ;;  %s97_s1 = inlined_call_operand.vmem [shape: f32[16,128], index: 1, kind: input, shape index: {}]   ;;  %s98_s2 = inlined_call_operand.vmem [shape: f32[8,128], index: 2, kind: output, shape index: {}]  }
   0x1   :  { %v18_v0 = vld [vmem:[%s97_s1] sm:$0xff]  ;;  %v19_v1 = vld [vmem:[%s97_s1 + $0x8] sm:$0xff] }
   0x2   :  { %v20_v2 = vld [vmem:[%s96_s0] sm:$0xff]  ;;  %v21_v3 = vld [vmem:[%s96_s0 + $0x8] sm:$0xff] }
   0x3   :  { %v22_v4 = vsub.f32 %v18_v0, %v20_v2  ;;  %v23_v5 = vsub.f32 %v19_v1, %v21_v3 }
   0x5   :  { %v24_v6 = vand.u32 2147483647, %v22_v4  ;;  %v26_v7 = vmul.f32 %v22_v4, %v22_v4  ;;  %v25_v8 = vand.u32 2147483647, %v23_v5  ;;  %v27_v9 = vmul.f32 %v23_v5, %v23_v5 }
   0x7   :  { %v28_v10 = vadd.f32 %v26_v7, %v24_v6  ;;  %v29_v11 = vadd.f32 %v27_v9, %v25_v8 }
   0x9   :  { %v37_v12 = vadd.f32 %v29_v11, %v28_v10 }
   0xb   :  { %61 = vst [vmem:[%s98_s2] sm:$0xff] %v37_v12 }

</bundles_post_ra>
